<compile_context>
chip_gen: v6e
topology: v6e:2x2x1
jax: 0.10.0
libtpu: 0.0.40
codegen_flags: <defaults>
</compile_context>

<pallas_src>
import jax
import jax.numpy as jnp
from jax.experimental import pallas as pl
from jax.experimental.pallas import tpu as pltpu


def _round_up(n, m):
    return ((n + m - 1) // m) * m


def ffn_kernel(x_ref, w1t_ref, b1_ref, w2t_ref, b2_ref, o_ref):
    x = x_ref[...]                                   # (tm, Hp), input dtype
    # conv1 (pointwise) — MXU matmul, f32 accumulation
    h = jnp.dot(x.astype(w1t_ref.dtype), w1t_ref[...],
                preferred_element_type=jnp.float32)
    # bias + ReLU in f32
    h = jnp.maximum(h + b1_ref[...], 0.0)
    # conv2 (pointwise)
    y = jnp.dot(h.astype(w2t_ref.dtype), w2t_ref[...],
                preferred_element_type=jnp.float32)
    # bias + residual in f32
    y = y + b2_ref[...] + x.astype(jnp.float32)
    o_ref[...] = y.astype(o_ref.dtype)


def pointwise_feedforward(x, w1, b1, w2, b2, *, tm=None, matmul_dtype=None):
    """x: (B, L, H).  w1, w2: (H, H) = Conv1d weight[:, :, 0].  b1, b2: (H,)."""
    B, L, H = x.shape
    M = B * L
    out_dtype = x.dtype
    mm_dtype = jnp.dtype(matmul_dtype) if matmul_dtype is not None else jnp.dtype(x.dtype)

    # ---- lane-dense hidden dim: pad H up to a multiple of 128 ----
    Hp = _round_up(H, 128)

    x_bytes = jnp.dtype(x.dtype).itemsize
    o_bytes = jnp.dtype(out_dtype).itemsize
    w_bytes = mm_dtype.itemsize

    # ---- row-tile selection under a VMEM budget (safe for v7x's 64 MiB) ----
    budget = 40 * 1024 * 1024
    fixed = 2 * (2 * Hp * Hp * w_bytes) + 2 * (2 * Hp * 4)   # weights + biases (double-buffered)
    per_row = 2 * Hp * (x_bytes + o_bytes)                   # x tile + out tile (double-buffered)
    if tm is None:
        tm_budget = max(8, min(1024, (budget - fixed) // per_row))
        tm_budget = (tm_budget // 8) * 8
        n_steps = pl.cdiv(M, tm_budget)
        if M > 512:
            n_steps = max(n_steps, 2)        # keep both v7x TensorCores busy
        tm = min(_round_up(pl.cdiv(M, n_steps), 8), _round_up(M, 8))
    tm = max(8, _round_up(tm, 8))
    Mp = _round_up(M, tm)

    # ---- pad & pre-transpose operands (zero padding is mathematically exact) ----
    xf = jnp.pad(x.reshape(M, H), ((0, Mp - M), (0, Hp - H)))
    w1t = jnp.pad(jnp.transpose(w1), ((0, Hp - H), (0, Hp - H))).astype(mm_dtype)
    w2t = jnp.pad(jnp.transpose(w2), ((0, Hp - H), (0, Hp - H))).astype(mm_dtype)
    b1r = jnp.pad(b1.astype(jnp.float32), (0, Hp - H)).reshape(1, Hp)
    b2r = jnp.pad(b2.astype(jnp.float32), (0, Hp - H)).reshape(1, Hp)

    vmem_est = fixed + tm * per_row
    vmem_limit = int(min(max(vmem_est * 5 // 4, 16 * 1024 * 1024), 48 * 1024 * 1024))

    out = pl.pallas_call(
        ffn_kernel,
        out_shape=jax.ShapeDtypeStruct((Mp, Hp), out_dtype),
        grid_spec=pltpu.PrefetchScalarGridSpec(
            num_scalar_prefetch=0,
            grid=(Mp // tm,),
            in_specs=[
                pl.BlockSpec((tm, Hp), lambda i: (i, 0)),    # x rows
                pl.BlockSpec((Hp, Hp), lambda i: (0, 0)),    # W1^T (VMEM-resident)
                pl.BlockSpec((1, Hp), lambda i: (0, 0)),     # b1
                pl.BlockSpec((Hp, Hp), lambda i: (0, 0)),    # W2^T (VMEM-resident)
                pl.BlockSpec((1, Hp), lambda i: (0, 0)),     # b2
            ],
            out_specs=pl.BlockSpec((tm, Hp), lambda i: (i, 0)),
        ),
        compiler_params=pltpu.CompilerParams(
            dimension_semantics=("parallel",),
            vmem_limit_bytes=vmem_limit,
        ),
    )(xf, w1t, b1r, w2t, b2r)
    return out[:M, :H].reshape(B, L, H)


def reference(x, w1, b1, w2, b2):
    hi = jax.lax.Precision.HIGHEST
    h = jnp.maximum(jnp.einsum("blh,oh->blo", x, w1, precision=hi) + b1, 0.0)
    return jnp.einsum("blh,oh->blo", h, w2, precision=hi) + b2 + x


if __name__ == "__main__":
    # 1) small case matching the module's toy shapes (single block, H 32 -> 128 padded)
    B, L, H = 2, 8, 32
    key = jax.random.PRNGKey(0)
    kx, k1, k2, k3, k4 = jax.random.split(key, 5)
    x = jax.random.normal(kx, (B, L, H), dtype=jnp.float32)
    w1 = jax.random.normal(k1, (H, H), dtype=jnp.float32) * 0.1
    b1 = jax.random.normal(k2, (H,), dtype=jnp.float32) * 0.1
    w2 = jax.random.normal(k3, (H, H), dtype=jnp.float32) * 0.1
    b2 = jax.random.normal(k4, (H,), dtype=jnp.float32) * 0.1

    out = jax.block_until_ready(pointwise_feedforward(x, w1, b1, w2, b2))
    ref = reference(x, w1, b1, w2, b2)
    assert out.shape == (B, L, H)
    assert jnp.allclose(out, ref, atol=1e-3, rtol=1e-3), "f32 small mismatch"

    # 2) larger f32 case exercising multi-step grid + row/lane padding (M=1200, H=200)
    B2, L2, H2 = 4, 300, 200
    kx2, k5, k6, k7, k8 = jax.random.split(jax.random.PRNGKey(1), 5)
    x2 = jax.random.normal(kx2, (B2, L2, H2), dtype=jnp.float32)
    w1b = jax.random.normal(k5, (H2, H2), dtype=jnp.float32) * 0.05
    b1b = jax.random.normal(k6, (H2,), dtype=jnp.float32) * 0.05
    w2b = jax.random.normal(k7, (H2, H2), dtype=jnp.float32) * 0.05
    b2b = jax.random.normal(k8, (H2,), dtype=jnp.float32) * 0.05
    out2 = jax.block_until_ready(pointwise_feedforward(x2, w1b, b1b, w2b, b2b))
    ref2 = reference(x2, w1b, b1b, w2b, b2b)
    assert jnp.allclose(out2, ref2, atol=1e-2, rtol=1e-2), "f32 large mismatch"

    # 3) bf16 end-to-end (half the HBM traffic; f32 accumulation + f32 elementwise inside)
    out3 = jax.block_until_ready(
        pointwise_feedforward(x2.astype(jnp.bfloat16),
                              w1b.astype(jnp.bfloat16), b1b,
                              w2b.astype(jnp.bfloat16), b2b))
    assert out3.dtype == jnp.bfloat16
    assert jnp.allclose(out3.astype(jnp.float32), ref2, atol=1e-1, rtol=1e-1), "bf16 mismatch"

    print("KERNEL_OK")
</pallas_src>

<mosaic_0001>
module attributes {stable_mosaic.version = 11 : i64} {
  func.func @ffn_kernel(%arg0: i32, %arg1: memref<16x128xf32, #tpu.memory_space<vmem>>, %arg2: memref<128x128xf32, #tpu.memory_space<vmem>>, %arg3: memref<1x128xf32, #tpu.memory_space<vmem>>, %arg4: memref<128x128xf32, #tpu.memory_space<vmem>>, %arg5: memref<1x128xf32, #tpu.memory_space<vmem>>, %arg6: memref<16x128xf32, #tpu.memory_space<vmem>>) attributes {dimension_semantics = [#tpu.dimension_semantics<parallel>], iteration_bounds = array<i64: 1>, scalar_prefetch = 0 : i64, scratch_operands = 0 : i64, tpu.core_type = #tpu.core_type<tc>, window_params = [{transform_indices = @transform_0, window_bounds = array<i64: 16, 128>}, {pipeline_mode = #tpu.pipeline_mode<synchronous>, transform_indices = @transform_1, window_bounds = array<i64: 128, 128>}, {pipeline_mode = #tpu.pipeline_mode<synchronous>, transform_indices = @transform_2, window_bounds = array<i64: 1, 128>}, {pipeline_mode = #tpu.pipeline_mode<synchronous>, transform_indices = @transform_3, window_bounds = array<i64: 128, 128>}, {pipeline_mode = #tpu.pipeline_mode<synchronous>, transform_indices = @transform_4, window_bounds = array<i64: 1, 128>}, {transform_indices = @transform_5, window_bounds = array<i64: 16, 128>}]} {
    %c0 = arith.constant 0 : index
    %c0_0 = arith.constant 0 : index
    %0 = vector.load %arg1[%c0, %c0_0] : memref<16x128xf32, #tpu.memory_space<vmem>>, vector<16x128xf32>
    %c0_1 = arith.constant 0 : index
    %c0_2 = arith.constant 0 : index
    %1 = vector.load %arg2[%c0_1, %c0_2] : memref<128x128xf32, #tpu.memory_space<vmem>>, vector<128x128xf32>
    %cst = arith.constant dense<0.000000e+00> : vector<16x128xf32>
    %2 = tpu.matmul %0, %1, %cst {dimension_numbers = #tpu.dot_dimension_numbers<[1], [0], [0], [1], [0, 0, 1, 1], [], []>} : vector<16x128xf32>, vector<128x128xf32>, vector<16x128xf32> -> vector<16x128xf32>
    %c0_3 = arith.constant 0 : index
    %c0_4 = arith.constant 0 : index
    %3 = vector.load %arg3[%c0_3, %c0_4] : memref<1x128xf32, #tpu.memory_space<vmem>>, vector<1x128xf32>
    %4 = vector.broadcast %3 : vector<1x128xf32> to vector<16x128xf32>
    %5 = arith.addf %2, %4 : vector<16x128xf32>
    %cst_5 = arith.constant 0.000000e+00 : f32
    %6 = vector.broadcast %cst_5 : f32 to vector<16x128xf32>
    %7 = arith.maximumf %5, %6 : vector<16x128xf32>
    %c0_6 = arith.constant 0 : index
    %c0_7 = arith.constant 0 : index
    %8 = vector.load %arg4[%c0_6, %c0_7] : memref<128x128xf32, #tpu.memory_space<vmem>>, vector<128x128xf32>
    %cst_8 = arith.constant dense<0.000000e+00> : vector<16x128xf32>
    %9 = tpu.matmul %7, %8, %cst_8 {dimension_numbers = #tpu.dot_dimension_numbers<[1], [0], [0], [1], [0, 0, 1, 1], [], []>} : vector<16x128xf32>, vector<128x128xf32>, vector<16x128xf32> -> vector<16x128xf32>
    %c0_9 = arith.constant 0 : index
    %c0_10 = arith.constant 0 : index
    %10 = vector.load %arg5[%c0_9, %c0_10] : memref<1x128xf32, #tpu.memory_space<vmem>>, vector<1x128xf32>
    %11 = vector.broadcast %10 : vector<1x128xf32> to vector<16x128xf32>
    %12 = arith.addf %9, %11 : vector<16x128xf32>
    %13 = arith.addf %12, %0 : vector<16x128xf32>
    %c0_11 = arith.constant 0 : index
    %c0_12 = arith.constant 0 : index
    %14 = vector.load %arg6[%c0_11, %c0_12] : memref<16x128xf32, #tpu.memory_space<vmem>>, vector<16x128xf32>
    tpu.vector_store %arg6[%c0_11, %c0_12], %13 {strides = array<i32>} : memref<16x128xf32, #tpu.memory_space<vmem>>, vector<16x128xf32>,
    return
  }
  func.func @transform_0(%arg0: i32) -> (i32, i32) {
    %c0_i32 = arith.constant 0 : i32
    %c0_i32_0 = arith.constant 0 : i32
    return %arg0, %c0_i32 : i32, i32
  }
  func.func @transform_1(%arg0: i32) -> (i32, i32) {
    %c0_i32 = arith.constant 0 : i32
    %c0_i32_0 = arith.constant 0 : i32
    %c0_i32_1 = arith.constant 0 : i32
    return %c0_i32, %c0_i32_0 : i32, i32
  }
  func.func @transform_2(%arg0: i32) -> (i32, i32) {
    %c0_i32 = arith.constant 0 : i32
    %c0_i32_0 = arith.constant 0 : i32
    %c0_i32_1 = arith.constant 0 : i32
    return %c0_i32, %c0_i32_0 : i32, i32
  }
  func.func @transform_3(%arg0: i32) -> (i32, i32) {
    %c0_i32 = arith.constant 0 : i32
    %c0_i32_0 = arith.constant 0 : i32
    %c0_i32_1 = arith.constant 0 : i32
    return %c0_i32, %c0_i32_0 : i32, i32
  }
  func.func @transform_4(%arg0: i32) -> (i32, i32) {
    %c0_i32 = arith.constant 0 : i32
    %c0_i32_0 = arith.constant 0 : i32
    %c0_i32_1 = arith.constant 0 : i32
    return %c0_i32, %c0_i32_0 : i32, i32
  }
  func.func @transform_5(%arg0: i32) -> (i32, i32) {
    %c0_i32 = arith.constant 0 : i32
    %c0_i32_0 = arith.constant 0 : i32
    return %arg0, %c0_i32 : i32, i32
  }
}

</mosaic_0001>

<bundles_post_ra>
// kernel: tpu_custom_call.1
= control target key start
LH: loop header
LB: loop body
LE: loop exit
PB: predicated region body
PF: predicated region fallthrough
CT: control target
= control target key end

     0   :  { %10 = vsyncpa [#allocation3], 0  ;;  %s554_s0 = inlined_call_operand.hbm [shape: f32[16,128], index: 0, kind: input, shape index: {}]   ;;  %s555_s1 = inlined_call_operand.hbm [shape: f32[128,128], index: 1, kind: input, shape index: {}]   ;;  %s556_s2 = inlined_call_operand.vmem [shape: f32[1,128], index: 2, kind: input, shape index: {}]   ;;  %s557_s3 = inlined_call_operand.hbm [shape: f32[128,128], index: 3, kind: input, shape index: {}]   ;;  %s558_s4 = inlined_call_operand.vmem [shape: f32[1,128], index: 4, kind: input, shape index: {}]   ;;  %s559_s5 = inlined_call_operand.hbm [shape: f32[16,128], index: 5, kind: output, shape index: {}]  }
   0x1   :  { %11 = vsyncpa [#allocation6], 0 }
   0x2   :  { %12 = vsyncpa [#allocation4], 0  ;;  %s484_s18 = smov [#allocation5]   ;;  %s485_s20 = smov [#allocation2]  }
   0x3   :  { %s30_s19 = sshll.u32 %s484_s18, 4  ;;  %s18_s21 = sshll.u32 %s485_s20, 4  ;;  %s31_s19 = int_to_ptr.vmem [resolvable:$true] %s30_s19  ;;  %s19_s21 = int_to_ptr.vmem [resolvable:$true] %s18_s21 }
   0x4   :  { %s406_s22 = scalar_lea.vmem %s31_s19, 2048  ;;  %p411_p1 = scmp.lt.s32.totalorder %s31_s19, %s31_s19 }
   0x5   :  { %p407_p0 = scmp.ne.s32.totalorder %s31_s19, %s406_s22  ;;  %p412_p2 = scmp.lt.s32.totalorder %s406_s22, %s406_s22 }
   0x7   :  { %p413_p3 = por %p412_p2, %p411_p1 }
   0x9   :  { %p414_p4 = pnand %p413_p3, %p407_p0 }
   0xb   :  { %417 = shalt.err (!%p414_p4)
}
   0xc   :  { %s486_s23 = smov 128   ;;  %s487_s24 = smov 8  }
   0xd   :  { %36 = dma.hbm_to_vmem [thread:$0]  %s555_s1, 2048, %s31_s19, [#allocation6], %s486_s23, %s486_s23, %s487_s24  }
   0xe   :  { %s426_s27 = scalar_lea.vmem %s19_s21, 256  ;;  %p431_p6 = scmp.lt.s32.totalorder %s19_s21, %s19_s21 }
   0xf   :  { %p427_p5 = scmp.ne.s32.totalorder %s19_s21, %s426_s27  ;;  %p432_p7 = scmp.lt.s32.totalorder %s426_s27, %s426_s27 }
  0x11   :  { %p433_p8 = por %p432_p7, %p431_p6 }
  0x13   :  { %p434_p9 = pnand %p433_p8, %p427_p5 }
  0x15   :  { %437 = shalt.err (!%p434_p9)
}
  0x16   :  { %24 = dma.hbm_to_vmem [thread:$0]  %s554_s0, 256, %s19_s21, [#allocation3], %s486_s23, %s486_s23, %s487_s24  }
  0x17   :  { %s488_s30 = smov [#allocation7]  }
  0x18   :  { %s44_s6 = sshll.u32 %s488_s30, 4  ;;  %s45_s6 = int_to_ptr.vmem [resolvable:$true] %s44_s6 }
  0x19   :  { %s446_s7 = scalar_lea.vmem %s45_s6, 2048  ;;  %p451_p11 = scmp.lt.s32.totalorder %s45_s6, %s45_s6 }
  0x1a   :  { %p447_p10 = scmp.ne.s32.totalorder %s45_s6, %s446_s7  ;;  %p452_p12 = scmp.lt.s32.totalorder %s446_s7, %s446_s7 }
  0x1c   :  { %p453_p13 = por %p452_p12, %p451_p11 }
  0x1e   :  { %p454_p0 = pnand %p453_p13, %p447_p10 }
  0x20   :  { %457 = shalt.err (!%p454_p0)
}
  0x21   :  { %50 = dma.hbm_to_vmem [thread:$0]  %s557_s3, 2048, %s45_s6, [#allocation6], %s486_s23, %s486_s23, %s487_s24  }
  0x22   :  { %478 = dma.done.wait [#allocation3], 256  }
  0x23   :  { %479 = vsyncadd [#allocation3], 4294967040 }
  0x24   :  { %480 = dma.done.wait [#allocation6], 4096  }
  0x25   :  { %481 = vsyncadd [#allocation6], 4294963200  ;;  %v79_v0 = vld [vmem:[#allocation5 + $0x78] sm:$0xff]  ;;  %v78_v1 = vld [vmem:[#allocation5 + $0x70] sm:$0xff]  ;;  %s489_s11 = smov [#allocation8]  }
  0x26   :  { %322 = vmatprep.subr.mxu0 %v79_v0  ;;  %v77_v2 = vld [vmem:[#allocation5 + $0x68] sm:$0xff]  ;;  %v76_v3 = vld [vmem:[#allocation5 + $0x60] sm:$0xff]  ;;  %v538_v4 = vld [vmem:[#allocation2] sm:$0xff]  ;;  %s271_s12 = sshll.u32 %s489_s11, 4  ;;  %s272_s12 = int_to_ptr.vmem [resolvable:$true] %s271_s12 }
  0x27   :  { %323 = vmatpush3.msra.mxu0 %v79_v0  ;;  %v75_v5 = vld [vmem:[#allocation5 + $0x58] sm:$0xff]  ;;  %354 = vmatprep.mubr.f32.mxu0 %v538_v4  ;;  %v178_v7 = vld [vmem:[#allocation7 + $0x70] sm:$0xff]  ;;  %v177_v9 = vld [vmem:[#allocation7 + $0x68] sm:$0xff]  ;;  %p463_p2 = scmp.lt.s32.totalorder %s272_s12, %s272_s12 }
  0x28   :  { %324 = vmatprep.subr.mxu0 %v78_v1  ;;  %v179_v6 = vld [vmem:[#allocation7 + $0x78] sm:$0xff]  ;;  %v74_v8 = vld [vmem:[#allocation5 + $0x50] sm:$0xff]  ;;  %v73_v10 = vld [vmem:[#allocation5 + $0x48] sm:$0xff] }
  0x29   :  { %325 = vmatpush3.msra.mxu0 %v78_v1  ;;  %357 = vmatprep.subr.mxu1 %v179_v6  ;;  %v176_v11 = vld [vmem:[#allocation7 + $0x60] sm:$0xff]  ;;  %v175_v13 = vld [vmem:[#allocation7 + $0x58] sm:$0xff]  ;;  %v174_v15 = vld [vmem:[#allocation7 + $0x50] sm:$0xff] }
  0x2a   :  { %326 = vmatprep.subr.mxu0 %v77_v2  ;;  %358 = vmatpush3.msra.mxu1 %v179_v6  ;;  %v72_v12 = vld [vmem:[#allocation5 + $0x40] sm:$0xff]  ;;  %v71_v14 = vld [vmem:[#allocation5 + $0x38] sm:$0xff]  ;;  %v70_v16 = vld [vmem:[#allocation5 + $0x30] sm:$0xff] }
  0x2b   :  { %327 = vmatpush3.msra.mxu0 %v77_v2  ;;  %359 = vmatprep.subr.mxu1 %v178_v7  ;;  %v173_v17 = vld [vmem:[#allocation7 + $0x48] sm:$0xff]  ;;  %v172_v19 = vld [vmem:[#allocation7 + $0x40] sm:$0xff]  ;;  %v171_v21 = vld [vmem:[#allocation7 + $0x38] sm:$0xff] }
  0x2c   :  { %328 = vmatprep.subr.mxu0 %v76_v3  ;;  %360 = vmatpush3.msra.mxu1 %v178_v7  ;;  %v69_v18 = vld [vmem:[#allocation5 + $0x28] sm:$0xff]  ;;  %v68_v20 = vld [vmem:[#allocation5 + $0x20] sm:$0xff]  ;;  %v67_v22 = vld [vmem:[#allocation5 + $0x18] sm:$0xff] }
  0x2d   :  { %329 = vmatpush3.msra.mxu0 %v76_v3  ;;  %361 = vmatprep.subr.mxu1 %v177_v9  ;;  %v170_v23 = vld [vmem:[#allocation7 + $0x30] sm:$0xff]  ;;  %v169_v25 = vld [vmem:[#allocation7 + $0x28] sm:$0xff]  ;;  %v168_v27 = vld [vmem:[#allocation7 + $0x20] sm:$0xff] }
  0x2e   :  { %330 = vmatprep.subr.mxu0 %v75_v5  ;;  %362 = vmatpush3.msra.mxu1 %v177_v9  ;;  %v66_v24 = vld [vmem:[#allocation5 + $0x10] sm:$0xff]  ;;  %v65_v26 = vld [vmem:[#allocation5 + $0x8] sm:$0xff]  ;;  %v64_v28 = vld [vmem:[#allocation5] sm:$0xff] }
  0x2f   :  { %331 = vmatpush3.msra.mxu0 %v75_v5  ;;  %363 = vmatprep.subr.mxu1 %v176_v11  ;;  %v63_v29 = vld [vmem:[#allocation2 + $0x8] sm:$0xff]  ;;  %v166_v31 = vld [vmem:[#allocation7 + $0x10] sm:$0xff]  ;;  %v165_v32 = vld [vmem:[#allocation7 + $0x8] sm:$0xff] }
  0x30   :  { %332 = vmatprep.subr.mxu0 %v74_v8  ;;  %364 = vmatpush3.msra.mxu1 %v176_v11  ;;  %v167_v30 = vld [vmem:[#allocation7 + $0x18] sm:$0xff]  ;;  %v164_v33 = vld [vmem:[#allocation7] sm:$0xff]  ;;  %v284_v34 = vld [vmem:[%s556_s2] ss:$0 sm:$0xff]  ;;  %s458_s2 = scalar_lea.vmem %s272_s12, 256 }
  0x31   :  { %333 = vmatpush3.msra.mxu0 %v74_v8  ;;  %365 = vmatprep.subr.mxu1 %v175_v13  ;;  %v285_v41 = vld [vmem:[%s558_s4] ss:$0 sm:$0xff]  ;;  %p459_p1 = scmp.ne.s32.totalorder %s272_s12, %s458_s2  ;;  %p464_p3 = scmp.lt.s32.totalorder %s458_s2, %s458_s2 }
  0x32   :  { %334 = vmatprep.subr.mxu0 %v73_v10  ;;  %366 = vmatpush3.msra.mxu1 %v175_v13 }
  0x33   :  { %335 = vmatpush3.msra.mxu0 %v73_v10  ;;  %367 = vmatprep.subr.mxu1 %v174_v15  ;;  %p465_p4 = por %p464_p3, %p463_p2 }
  0x34   :  { %336 = vmatprep.subr.mxu0 %v72_v12  ;;  %368 = vmatpush3.msra.mxu1 %v174_v15 }
  0x35   :  { %337 = vmatpush3.msra.mxu0 %v72_v12  ;;  %369 = vmatprep.subr.mxu1 %v173_v17  ;;  %p466_p5 = pnand %p465_p4, %p459_p1 }
  0x36   :  { %338 = vmatprep.subr.mxu0 %v71_v14  ;;  %370 = vmatpush3.msra.mxu1 %v173_v17 }
  0x37   :  { %339 = vmatpush3.msra.mxu0 %v71_v14  ;;  %371 = vmatprep.subr.mxu1 %v172_v19 }
  0x38   :  { %340 = vmatprep.subr.mxu0 %v70_v16  ;;  %372 = vmatpush3.msra.mxu1 %v172_v19 }
  0x39   :  { %341 = vmatpush3.msra.mxu0 %v70_v16  ;;  %373 = vmatprep.subr.mxu1 %v171_v21 }
  0x3a   :  { %342 = vmatprep.subr.mxu0 %v69_v18  ;;  %374 = vmatpush3.msra.mxu1 %v171_v21 }
  0x3b   :  { %343 = vmatpush3.msra.mxu0 %v69_v18  ;;  %375 = vmatprep.subr.mxu1 %v170_v23 }
  0x3c   :  { %344 = vmatprep.subr.mxu0 %v68_v20  ;;  %376 = vmatpush3.msra.mxu1 %v170_v23 }
  0x3d   :  { %345 = vmatpush3.msra.mxu0 %v68_v20  ;;  %377 = vmatprep.subr.mxu1 %v169_v25 }
  0x3e   :  { %346 = vmatprep.subr.mxu0 %v67_v22  ;;  %378 = vmatpush3.msra.mxu1 %v169_v25 }
  0x3f   :  { %347 = vmatpush3.msra.mxu0 %v67_v22  ;;  %379 = vmatprep.subr.mxu1 %v168_v27 }
  0x40   :  { %348 = vmatprep.subr.mxu0 %v66_v24  ;;  %380 = vmatpush3.msra.mxu1 %v168_v27 }
  0x41   :  { %349 = vmatpush3.msra.mxu0 %v66_v24  ;;  %381 = vmatprep.subr.mxu1 %v167_v30 }
  0x42   :  { %350 = vmatprep.subr.mxu0 %v65_v26  ;;  %382 = vmatpush3.msra.mxu1 %v167_v30 }
  0x43   :  { %351 = vmatpush3.msra.mxu0 %v65_v26  ;;  %383 = vmatprep.subr.mxu1 %v166_v31 }
  0x44   :  { %352 = vmatprep.subr.mxu0 %v64_v28  ;;  %384 = vmatpush3.msra.mxu1 %v166_v31 }
  0x45   :  { %353 = vmatpush3.msra.mxu0 %v64_v28  ;;  %385 = vmatprep.subr.mxu1 %v165_v32 }
  0x46   :  { %355 = vmatmul.mubr.f32.vlgmr.msra.gmra.mxu0 %v63_v29  ;;  %386 = vmatpush3.msra.mxu1 %v165_v32 }
  0x47   :  { %387 = vmatprep.subr.mxu1 %v164_v33 }
  0x48   :  { %388 = vmatpush3.msra.mxu1 %v164_v33 }
 0x106   :  { %v356_v35 = vpop.f32.mrf.mxu0 }
 0x107   :  { %v159_v36 = vadd.f32 %v356_v35, %v284_v34 }
 0x108   :  { %v153_v37 = vpop.f32.mrf.mxu0 }
 0x109   :  { %v154_v38 = vadd.f32 %v284_v34, %v153_v37  ;;  %v163_v40 = vmax.f32 %v159_v36, 0.0 }
 0x10b   :  { %v162_v39 = vmax.f32 %v154_v38, 0.0 }
 0x10d   :  { %389 = vmatprep.mubr.f32.mxu1 %v162_v39 }
 0x10e   :  { %390 = vmatmul.mubr.f32.vlgmr.msra.gmra.mxu1 %v163_v40 }
 0x1ce   :  { %v391_v42 = vpop.f32.mrf.mxu1 }
 0x1cf   :  { %v259_v43 = vadd.f32 %v391_v42, %v285_v41 }
 0x1d0   :  { %v253_v44 = vpop.f32.mrf.mxu1 }
 0x1d1   :  { %v263_v45 = vadd.f32 %v259_v43, %v63_v29  ;;  %v254_v46 = vadd.f32 %v285_v41, %v253_v44 }
 0x1d3   :  { %265 = vst [vmem:[#allocation8 + $0x8] sm:$0xff] %v263_v45  ;;  %v262_v47 = vadd.f32 %v254_v46, %v538_v4 }
 0x1d5   :  { %264 = vst [vmem:[#allocation8] sm:$0xff] %v262_v47 }
 0x1d6   :  { %469 = shalt.err (!%p466_p5)
}
 0x1d7   :  { %277 = dma.vmem_to_hbm [thread:$0]  %s272_s12, 256, %s559_s5, [#allocation4], %s486_s23, %s486_s23, %s487_s24  }
 0x1d8   :  { %482 = dma.done.wait [#allocation4], 256  }
 0x1d9   :  { %483 = vsyncadd [#allocation4], 4294967040 }
 0x1da   :  { %281 = vsyncpa [#allocation3], 1 }
 0x1db   :  { %282 = vsyncpa [#allocation6], 1 }
 0x1dc   :  { %283 = vsyncpa [#allocation4], 1 }

</bundles_post_ra>
